<compile_context>
chip_gen: v6e
topology: v6e:2x2x1
jax: 0.10.0
libtpu: 0.0.40
codegen_flags: <defaults>
</compile_context>

<pallas_src>
import functools
import math

import jax
import jax.numpy as jnp
from jax.experimental import pallas as pl
from jax.experimental.pallas import tpu as pltpu

_LANE = 128
_TILE_BYTES = 8 * 1024 * 1024       # ~8 MiB per tile (x4 with in+out double-buffering)
_VMEM_LIMIT = 48 * 1024 * 1024      # explicit scoped VMEM limit; < 64 MiB v7x physical

_SUBLANE_PACK = {4: 8, 2: 16, 1: 32}   # dtype itemsize -> sublane packing


def _scale_kernel(x_ref, o_ref, *, scale):
    # Pure streaming kernel: load tile, multiply by trace-time constant, store.
    o_ref[...] = x_ref[...] * scale


def positional_encoder_forward(x, d_model, *, donate_x=False):
    """x: (..., d_model). Returns x * sqrt(d_model) (+ pe==zeros, a no-op).

    Set donate_x=True only if the caller donates x (jax.jit donate_argnums);
    then the output buffer is aliased onto the input for a true in-place rescale.
    """
    assert x.shape[-1] == d_model
    scale = math.sqrt(d_model)
    orig_shape = x.shape
    itemsize = jnp.dtype(x.dtype).itemsize
    pack = _SUBLANE_PACK.get(itemsize, 8)

    # --- lane-dense 2D slab: flatten and pad to a multiple of 128 lanes ---------
    # Padding a pure multiply is free and keeps every store an unmasked full-lane vst.
    n = x.size
    pad = (-n) % _LANE
    flat = x.reshape(-1)
    if pad:
        flat = jnp.pad(flat, (0, pad))
    rows = (n + pad) // _LANE
    x2 = flat.reshape(rows, _LANE)

    # --- row tiling: ~8 MiB tiles, sublane-pack aligned, >=2 grid steps if possible
    bytes_per_row = _LANE * itemsize
    target_rows = max(pack, _TILE_BYTES // bytes_per_row)
    target_rows = (target_rows // pack) * pack
    if rows <= pack:
        tm = rows                      # single full block (== full dim, satisfies tiling rule)
    else:
        # cap at half the rows (rounded up to the pack) so the parallel grid axis
        # has at least 2 steps -> both v7x TensorCores get work
        half = ((pl.cdiv(rows, 2) + pack - 1) // pack) * pack
        tm = max(pack, min(target_rows, half))
        if tm >= rows:
            tm = rows
    grid = (pl.cdiv(rows, tm),)

    kernel = functools.partial(_scale_kernel, scale=scale)

    out2 = pl.pallas_call(
        kernel,
        out_shape=jax.ShapeDtypeStruct((rows, _LANE), x.dtype),
        grid_spec=pltpu.PrefetchScalarGridSpec(
            num_scalar_prefetch=0,
            grid=grid,
            in_specs=[pl.BlockSpec((tm, _LANE), lambda i: (i, 0))],
            out_specs=pl.BlockSpec((tm, _LANE), lambda i: (i, 0)),
        ),
        # Only alias in-place when x is actually donated; otherwise XLA would insert
        # a defensive copy that doubles memory traffic.
        input_output_aliases=({0: 0} if donate_x else {}),
        cost_estimate=pl.CostEstimate(
            flops=n, transcendentals=0, bytes_accessed=2 * n * itemsize),
        compiler_params=pltpu.CompilerParams(
            dimension_semantics=("parallel",),
            vmem_limit_bytes=_VMEM_LIMIT,
        ),
    )(x2)

    out_flat = out2.reshape(-1)
    if pad:
        out_flat = out_flat[:n]
    return out_flat.reshape(orig_shape)

    # TODO(synk): the reference forward never applies the sinusoidal table built in
    # __init__ (it adds zeros); this kernel faithfully reproduces that behavior.


if __name__ == "__main__":
    key = jax.random.PRNGKey(0)
    B, S, d_model = 2, 8, 32
    x = jax.random.normal(key, (B, S, d_model), dtype=jnp.float32)

    # Reference (pure JAX): x * sqrt(d_model) + zeros(d_model) == x * sqrt(d_model)
    ref = x * math.sqrt(d_model)
    out = jax.block_until_ready(positional_encoder_forward(x, d_model))
    assert out.shape == x.shape and out.dtype == x.dtype
    assert jnp.allclose(out, ref, atol=1e-5, rtol=1e-5)

    # Secondary check: lane-unaligned total size exercises the pad-and-slice path.
    d2 = 24
    x_u = jax.random.normal(jax.random.PRNGKey(1), (2, 5, d2), dtype=jnp.float32)
    ref_u = x_u * math.sqrt(d2)
    out_u = jax.block_until_ready(positional_encoder_forward(x_u, d2))
    assert out_u.shape == x_u.shape and out_u.dtype == x_u.dtype
    assert jnp.allclose(out_u, ref_u, atol=1e-5, rtol=1e-5)

    print("KERNEL_OK")
</pallas_src>

<mosaic_0001>
module attributes {stable_mosaic.version = 11 : i64} {
  func.func @_scale_kernel(%arg0: i32, %arg1: memref<4x128xf32, #tpu.memory_space<vmem>>, %arg2: memref<4x128xf32, #tpu.memory_space<vmem>>) attributes {dimension_semantics = [#tpu.dimension_semantics<parallel>], iteration_bounds = array<i64: 1>, scalar_prefetch = 0 : i64, scratch_operands = 0 : i64, tpu.core_type = #tpu.core_type<tc>, window_params = [{transform_indices = @transform_0, window_bounds = array<i64: 4, 128>}, {transform_indices = @transform_1, window_bounds = array<i64: 4, 128>}]} {
    %c0 = arith.constant 0 : index
    %c0_0 = arith.constant 0 : index
    %0 = vector.load %arg1[%c0, %c0_0] : memref<4x128xf32, #tpu.memory_space<vmem>>, vector<4x128xf32>
    %cst = arith.constant 5.65685415 : f32
    %1 = vector.broadcast %cst : f32 to vector<4x128xf32>
    %2 = arith.mulf %0, %1 : vector<4x128xf32>
    %c0_1 = arith.constant 0 : index
    %c0_2 = arith.constant 0 : index
    %3 = vector.load %arg2[%c0_1, %c0_2] : memref<4x128xf32, #tpu.memory_space<vmem>>, vector<4x128xf32>
    tpu.vector_store %arg2[%c0_1, %c0_2], %2 {strides = array<i32>} : memref<4x128xf32, #tpu.memory_space<vmem>>, vector<4x128xf32>,
    return
  }
  func.func @transform_0(%arg0: i32) -> (i32, i32) {
    %c0_i32 = arith.constant 0 : i32
    %c0_i32_0 = arith.constant 0 : i32
    return %arg0, %c0_i32 : i32, i32
  }
  func.func @transform_1(%arg0: i32) -> (i32, i32) {
    %c0_i32 = arith.constant 0 : i32
    %c0_i32_0 = arith.constant 0 : i32
    return %arg0, %c0_i32 : i32, i32
  }
}

</mosaic_0001>

<bundles_post_ra>
// kernel: tpu_custom_call.1
= control target key start
LH: loop header
LB: loop body
LE: loop exit
PB: predicated region body
PF: predicated region fallthrough
CT: control target
= control target key end

     0   :  { %6 = vsyncpa [#allocation3], 0  ;;  %s103_s0 = inlined_call_operand.hbm [shape: f32[4,128], index: 0, kind: input, shape index: {}]   ;;  %s104_s1 = inlined_call_operand.hbm [shape: f32[4,128], index: 1, kind: output, shape index: {}]  }
   0x1   :  { %7 = vsyncpa [#allocation4], 0  ;;  %s85_s6 = smov [#allocation2]  }
   0x2   :  { %s14_s7 = sshll.u32 %s85_s6, 4  ;;  %s15_s7 = int_to_ptr.vmem [resolvable:$true] %s14_s7 }
   0x3   :  { %s49_s8 = scalar_lea.vmem %s15_s7, 64  ;;  %p54_p1 = scmp.lt.s32.totalorder %s15_s7, %s15_s7 }
   0x4   :  { %p50_p0 = scmp.ne.s32.totalorder %s15_s7, %s49_s8  ;;  %p55_p2 = scmp.lt.s32.totalorder %s49_s8, %s49_s8 }
   0x6   :  { %p56_p3 = por %p55_p2, %p54_p1 }
   0x8   :  { %p57_p4 = pnand %p56_p3, %p50_p0 }
   0xa   :  { %60 = shalt.err (!%p57_p4)
}
   0xb   :  { %17 = dma.hbm_to_vmem [thread:$0]  %s103_s0, 64, %s15_s7, [#allocation3]  }
   0xc   :  { %81 = dma.done.wait [#allocation3], 64  }
   0xd   :  { %82 = vsyncadd [#allocation3], 4294967232  ;;  %s86_s11 = smov [#allocation5]   ;;  %v21_v0 = vld [vmem:[#allocation2] sm:$0xf] }
   0xe   :  { %s30_s12 = sshll.u32 %s86_s11, 4  ;;  %v22_v1 = vmul.f32 5.656854, %v21_v0  ;;  %s31_s12 = int_to_ptr.vmem [resolvable:$true] %s30_s12 }
   0xf   :  { %s61_s13 = scalar_lea.vmem %s31_s12, 64  ;;  %p66_p6 = scmp.lt.s32.totalorder %s31_s12, %s31_s12 }
  0x10   :  { %23 = vst [vmem:[#allocation5] sm:$0xf] %v22_v1  ;;  %p62_p5 = scmp.ne.s32.totalorder %s31_s12, %s61_s13  ;;  %p67_p7 = scmp.lt.s32.totalorder %s61_s13, %s61_s13 }
  0x12   :  { %p68_p8 = por %p67_p7, %p66_p6 }
  0x14   :  { %p69_p9 = pnand %p68_p8, %p62_p5 }
  0x16   :  { %72 = shalt.err (!%p69_p9)
}
  0x17   :  { %33 = dma.vmem_to_hbm [thread:$0]  %s31_s12, 64, %s104_s1, [#allocation4]  }
  0x18   :  { %83 = dma.done.wait [#allocation4], 64  }
  0x19   :  { %84 = vsyncadd [#allocation4], 4294967232 }
  0x1a   :  { %37 = vsyncpa [#allocation3], 1 }
  0x1b   :  { %38 = vsyncpa [#allocation4], 1 }

</bundles_post_ra>
